<compile_context>
chip_gen: v6e
topology: v6e:2x2x1
jax: 0.10.0
libtpu: 0.0.40
codegen_flags: <defaults>
</compile_context>

<pallas_src>
import jax
import jax.numpy as jnp
from jax import lax
from jax.experimental import pallas as pl
from jax.experimental.pallas import tpu as pltpu

_DELTA = 1e-07
_LANE = 128
_SUBLANE = 8
# VMEM budget for the double-buffered input blocks (2 inputs x 2 buffers),
# conservative enough to fit comfortably inside v7x's 64 MiB VMEM per core.
_VMEM_INPUT_BUDGET = 32 * 1024 * 1024
_VMEM_LIMIT_BYTES = 48 * 1024 * 1024
_MAX_CARRY_ROWS = 64  # above this, accumulate into VMEM refs (avoid vreg spill)


def _round_up(x, m):
    return (x + m - 1) // m * m


def _round_down(x, m):
    return (x // m) * m


def _make_sdr_kernel(tiles_per_block, tail_full_tiles, tail_rem, need_mask,
                     use_ref_acc, unroll):
    """Build the SDR kernel with the static chunk geometry baked in."""

    def kernel(est_ref, ref_ref, out_ref, rr_acc, ee_acc, er_acc):
        k = pl.program_id(1)          # reduction (chunk) axis, innermost
        nk = pl.num_programs(1)
        bb = rr_acc.shape[0]

        @pl.when(k == 0)
        def _():
            rr_acc[...] = jnp.zeros_like(rr_acc)
            ee_acc[...] = jnp.zeros_like(ee_acc)
            er_acc[...] = jnp.zeros_like(er_acc)

        def load(off):
            r = ref_ref[:, pl.ds(off, _LANE)].astype(jnp.float32)
            e = est_ref[:, pl.ds(off, _LANE)].astype(jnp.float32)
            return r, e

        def masked_ragged_tile(off, rem_cols):
            lane = lax.broadcasted_iota(jnp.int32, (bb, _LANE), 1)
            valid = lane < rem_cols
            r, e = load(off)
            r = jnp.where(valid, r, 0.0)
            e = jnp.where(valid, e, 0.0)
            return r, e

        def accumulate(n_full_tiles, rem_cols):
            if use_ref_acc:
                # Tall batch block: accumulate straight into VMEM scratch so the
                # compiler never has to carry huge vreg sets through the loop.
                if n_full_tiles > 0:
                    @pl.loop(0, n_full_tiles)
                    def _(j):
                        off = pl.multiple_of(j * _LANE, _LANE)
                        r, e = load(off)
                        rr_acc[...] += r * r
                        ee_acc[...] += e * e
                        er_acc[...] += e * r
                if rem_cols:
                    r, e = masked_ragged_tile(n_full_tiles * _LANE, rem_cols)
                    rr_acc[...] += r * r
                    ee_acc[...] += e * e
                    er_acc[...] += e * r
            else:
                def tile_body(j, carry):
                    rr, ee, er = carry
                    off = pl.multiple_of(j * _LANE, _LANE)
                    r, e = load(off)
                    return rr + r * r, ee + e * e, er + e * r

                zero = jnp.zeros((bb, _LANE), jnp.float32)
                carry = (zero, zero, zero)
                if n_full_tiles > 0:
                    carry = lax.fori_loop(0, n_full_tiles, tile_body, carry,
                                          unroll=min(unroll, n_full_tiles))
                rr, ee, er = carry
                if rem_cols:
                    r, e = masked_ragged_tile(n_full_tiles * _LANE, rem_cols)
                    rr = rr + r * r
                    ee = ee + e * e
                    er = er + e * r
                rr_acc[...] += rr
                ee_acc[...] += ee
                er_acc[...] += er

        if need_mask:
            # Only the last (ragged) chunk pays any masking cost, and it only
            # touches the tiles that actually contain valid data.
            @pl.when(k == nk - 1)
            def _():
                accumulate(tail_full_tiles, tail_rem)

            @pl.when(k != nk - 1)
            def _():
                accumulate(tiles_per_block, 0)
        else:
            accumulate(tiles_per_block, 0)

        @pl.when(k == nk - 1)
        def _():
            num = jnp.sum(rr_acc[...], axis=-1, keepdims=True)
            ee_s = jnp.sum(ee_acc[...], axis=-1, keepdims=True)
            er_s = jnp.sum(er_acc[...], axis=-1, keepdims=True)
            den = jnp.maximum(num + ee_s - 2.0 * er_s, 0.0) + _DELTA  # relu().add(delta)
            num = num + _DELTA
            out_ref[...] = (10.0 * (jnp.log10(num) - jnp.log10(den))).astype(out_ref.dtype)

    return kernel


def sdr(estimates, references):
    """Pallas implementation of SDR.forward. Returns shape (B,)."""
    # torch promotes estimates -> references.dtype.  Only materialize that cast
    # when it narrows: widening (e.g. bf16 -> f32) is exact and done per-tile
    # in the kernel, keeping the HBM stream narrow.
    if estimates.dtype != references.dtype:
        if jnp.dtype(estimates.dtype).itemsize > jnp.dtype(references.dtype).itemsize:
            estimates = estimates.astype(references.dtype)

    # Crop to common last-axis length, flatten per batch (matches the module).
    length = min(references.shape[-1], estimates.shape[-1])
    references = references[..., :length].reshape(references.shape[0], -1)
    estimates = estimates[..., :length].reshape(estimates.shape[0], -1)

    B, N = references.shape
    out_dtype = references.dtype

    if N == 0:
        # num = den = delta  ->  10 * (log10(delta) - log10(delta)) = 0
        return jnp.zeros((B,), out_dtype)

    if N < _LANE:
        # Tiny input: zero-pad up to one lane tile (cheap; zeros contribute
        # exactly 0 to all three dot products so no masking is needed).
        pad = _LANE - N
        references = jnp.pad(references, ((0, 0), (0, pad)))
        estimates = jnp.pad(estimates, ((0, 0), (0, pad)))
    n_cols = references.shape[1]
    n_cols_aligned = _round_down(n_cols, _LANE)

    bytes_per_col = (jnp.dtype(estimates.dtype).itemsize
                     + jnp.dtype(references.dtype).itemsize)

    # --- batch blocking ------------------------------------------------------
    # Mosaic requires the sublane block dim to be 8-aligned or the full extent.
    if B % _SUBLANE == 0 and B >= 2 * _SUBLANE:
        b_blk = _SUBLANE
    else:
        b_blk = B

    # --- column blocking: as large as the VMEM input budget allows ------------
    pair_budget = _VMEM_INPUT_BUDGET // 2              # double-buffered inputs
    rows_resident = _round_up(b_blk, _SUBLANE)
    max_chunk = _round_down(pair_budget // (rows_resident * bytes_per_col), _LANE)
    max_chunk = max(max_chunk, _LANE)
    chunk = min(max_chunk, n_cols_aligned)

    # Short columns + divisible batch: widen the batch block (still a multiple
    # of 8 dividing B, keeping >= 2 blocks so the "parallel" axis can still
    # megacore-shard) so per-grid-step overhead stays amortized.
    if b_blk < B:
        while (2 * b_blk <= B // 2 and B % (2 * b_blk) == 0
               and 2 * b_blk <= _MAX_CARRY_ROWS
               and 2 * b_blk * chunk * bytes_per_col * 2 <= _VMEM_INPUT_BUDGET):
            b_blk *= 2
    n_b_blocks = B // b_blk

    n_chunks = pl.cdiv(n_cols, chunk)
    tiles_per_block = chunk // _LANE
    need_mask = (n_cols % chunk) != 0          # ragged last chunk
    tail_cols = n_cols - (n_chunks - 1) * chunk
    tail_full_tiles = tail_cols // _LANE
    tail_rem = tail_cols % _LANE

    rows_padded = _round_up(b_blk, _SUBLANE)
    use_ref_acc = rows_padded > _MAX_CARRY_ROWS
    # Keep (unrolled loads + carries) within the 64-vreg register file.
    unroll = 1 if use_ref_acc else max(1, 64 // rows_padded)

    kernel = _make_sdr_kernel(tiles_per_block, tail_full_tiles, tail_rem,
                              need_mask, use_ref_acc, unroll)

    out = pl.pallas_call(
        kernel,
        out_shape=jax.ShapeDtypeStruct((B, 1), out_dtype),
        grid_spec=pltpu.PrefetchScalarGridSpec(
            num_scalar_prefetch=0,
            grid=(n_b_blocks, n_chunks),
            in_specs=[
                pl.BlockSpec((b_blk, chunk), lambda i, k: (i, k)),
                pl.BlockSpec((b_blk, chunk), lambda i, k: (i, k)),
            ],
            out_specs=pl.BlockSpec((b_blk, 1), lambda i, k: (i, 0)),
            scratch_shapes=[
                pltpu.VMEM((b_blk, _LANE), jnp.float32),
                pltpu.VMEM((b_blk, _LANE), jnp.float32),
                pltpu.VMEM((b_blk, _LANE), jnp.float32),
            ],
        ),
        compiler_params=pltpu.CompilerParams(
            dimension_semantics=("parallel", "arbitrary"),
            vmem_limit_bytes=_VMEM_LIMIT_BYTES,
        ),
    )(estimates, references)

    return out[:, 0]


def _sdr_ref(estimates, references):
    """Pure-JAX reference (torch semantics, f32 accumulation)."""
    if estimates.dtype != references.dtype:
        estimates = estimates.astype(references.dtype)
    length = min(references.shape[-1], estimates.shape[-1])
    r = references[..., :length].reshape(references.shape[0], -1).astype(jnp.float32)
    e = estimates[..., :length].reshape(estimates.shape[0], -1).astype(jnp.float32)
    delta = 1e-07
    num = jnp.einsum('bi,bi->b', r, r)
    den = num + jnp.einsum('bi,bi->b', e, e) - 2.0 * jnp.einsum('bi,bi->b', e, r)
    den = jnp.log10(jnp.maximum(den, 0.0) + delta)
    num = jnp.log10(num + delta)
    return (10.0 * (num - den)).astype(references.dtype)


if __name__ == "__main__":
    key = jax.random.PRNGKey(0)
    k1, k2, k3, k4, k5, k6 = jax.random.split(key, 6)

    # Case 1: small (batch, channels, time); N = 64 < 128 exercises the tiny-pad path.
    B, C, T = 2, 4, 16
    refs1 = jax.random.normal(k1, (B, C, T), dtype=jnp.float32)
    ests1 = refs1 + 0.1 * jax.random.normal(k2, (B, C, T), dtype=jnp.float32)
    out1 = jax.block_until_ready(sdr(ests1, refs1))
    exp1 = _sdr_ref(ests1, refs1)
    assert out1.shape == (B,)
    assert jnp.allclose(out1, exp1, rtol=1e-4, atol=1e-4), (out1, exp1)

    # Case 2: ragged length -> multi-chunk grid + tail-only masking, plus
    # cropping (estimates longer than references on the time axis).
    B2, C2, T2 = 3, 2, 333
    refs2 = jax.random.normal(k3, (B2, C2, T2), dtype=jnp.float32)
    ests2 = jnp.pad(refs2, ((0, 0), (0, 0), (0, 5))) \
        + 0.05 * jax.random.normal(k4, (B2, C2, T2 + 5), dtype=jnp.float32)
    out2 = jax.block_until_ready(sdr(ests2, refs2))
    exp2 = _sdr_ref(ests2, refs2)
    assert out2.shape == (B2,)
    assert jnp.allclose(out2, exp2, rtol=1e-4, atol=1e-4), (out2, exp2)

    # Case 3: bf16 estimates vs f32 references -> no wrapper upcast (bf16 stays
    # narrow in HBM); the kernel casts to f32 after the load.
    ests3 = ests1.astype(jnp.bfloat16)
    out3 = jax.block_until_ready(sdr(ests3, refs1))
    exp3 = _sdr_ref(ests3, refs1)
    assert jnp.allclose(out3, exp3, rtol=1e-3, atol=1e-3), (out3, exp3)

    # Case 4: batch divisible by 8 -> multiple batch blocks on the "parallel"
    # grid axis + ragged columns.
    B4, C4, T4 = 16, 1, 200
    refs4 = jax.random.normal(k5, (B4, C4, T4), dtype=jnp.float32)
    ests4 = refs4 + 0.2 * jax.random.normal(k6, (B4, C4, T4), dtype=jnp.float32)
    out4 = jax.block_until_ready(sdr(ests4, refs4))
    exp4 = _sdr_ref(ests4, refs4)
    assert out4.shape == (B4,)
    assert jnp.allclose(out4, exp4, rtol=1e-4, atol=1e-4), (out4, exp4)

    print("KERNEL_OK")
</pallas_src>

<mosaic_0001>
module attributes {stable_mosaic.version = 11 : i64} {
  func.func @kernel(%arg0: i32, %arg1: i32, %arg2: memref<2x128xf32, #tpu.memory_space<vmem>>, %arg3: memref<2x128xf32, #tpu.memory_space<vmem>>, %arg4: memref<2x1xf32, #tpu.memory_space<vmem>>, %arg5: memref<2x128xf32, #tpu.memory_space<vmem>>, %arg6: memref<2x128xf32, #tpu.memory_space<vmem>>, %arg7: memref<2x128xf32, #tpu.memory_space<vmem>>) attributes {dimension_semantics = [#tpu.dimension_semantics<parallel>, #tpu.dimension_semantics<arbitrary>], iteration_bounds = array<i64: 1, 1>, scalar_prefetch = 0 : i64, scratch_operands = 3 : i64, tpu.core_type = #tpu.core_type<tc>, window_params = [{transform_indices = @transform_0, window_bounds = array<i64: 2, 128>}, {transform_indices = @transform_1, window_bounds = array<i64: 2, 128>}, {transform_indices = @transform_2, window_bounds = array<i64: 2, 1>}]} {
    %c0_i32 = arith.constant 0 : i32
    %0 = arith.cmpi eq, %arg1, %c0_i32 : i32
    %1 = arith.extui %0 : i1 to i32
    %c0_i32_0 = arith.constant 0 : i32
    %2 = arith.cmpi ne, %1, %c0_i32_0 : i32
    scf.if %2 {
      %cst_17 = arith.constant 0.000000e+00 : f32
      %28 = vector.broadcast %cst_17 : f32 to vector<2x128xf32>
      %c0_18 = arith.constant 0 : index
      %c0_19 = arith.constant 0 : index
      %29 = vector.load %arg5[%c0_18, %c0_19] : memref<2x128xf32, #tpu.memory_space<vmem>>, vector<2x128xf32>
      tpu.vector_store %arg5[%c0_18, %c0_19], %28 {strides = array<i32>} : memref<2x128xf32, #tpu.memory_space<vmem>>, vector<2x128xf32>,
      %cst_20 = arith.constant 0.000000e+00 : f32
      %30 = vector.broadcast %cst_20 : f32 to vector<2x128xf32>
      %c0_21 = arith.constant 0 : index
      %c0_22 = arith.constant 0 : index
      %31 = vector.load %arg6[%c0_21, %c0_22] : memref<2x128xf32, #tpu.memory_space<vmem>>, vector<2x128xf32>
      tpu.vector_store %arg6[%c0_21, %c0_22], %30 {strides = array<i32>} : memref<2x128xf32, #tpu.memory_space<vmem>>, vector<2x128xf32>,
      %cst_23 = arith.constant 0.000000e+00 : f32
      %32 = vector.broadcast %cst_23 : f32 to vector<2x128xf32>
      %c0_24 = arith.constant 0 : index
      %c0_25 = arith.constant 0 : index
      %33 = vector.load %arg7[%c0_24, %c0_25] : memref<2x128xf32, #tpu.memory_space<vmem>>, vector<2x128xf32>
      tpu.vector_store %arg7[%c0_24, %c0_25], %32 {strides = array<i32>} : memref<2x128xf32, #tpu.memory_space<vmem>>, vector<2x128xf32>,
    } else {
    }
    %cst = arith.constant 0.000000e+00 : f32
    %3 = vector.broadcast %cst : f32 to vector<2x128xf32>
    %c0_i32_1 = arith.constant 0 : i32
    %c128_i32 = arith.constant 128 : i32
    %4 = arith.muli %c0_i32_1, %c128_i32 : i32
    %5 = tpu.assume_multiple %4, 128 : i32
    %c0 = arith.constant 0 : index
    %6 = arith.index_cast %5 : i32 to index
    %7 = vector.load %arg3[%c0, %6] : memref<2x128xf32, #tpu.memory_space<vmem>>, vector<2x128xf32>
    %c0_2 = arith.constant 0 : index
    %8 = arith.index_cast %5 : i32 to index
    %9 = vector.load %arg2[%c0_2, %8] : memref<2x128xf32, #tpu.memory_space<vmem>>, vector<2x128xf32>
    %10 = arith.mulf %7, %7 : vector<2x128xf32>
    %11 = arith.addf %3, %10 : vector<2x128xf32>
    %12 = arith.mulf %9, %9 : vector<2x128xf32>
    %13 = arith.addf %3, %12 : vector<2x128xf32>
    %14 = arith.mulf %9, %7 : vector<2x128xf32>
    %15 = arith.addf %3, %14 : vector<2x128xf32>
    %c1_i32 = arith.constant 1 : i32
    %c0_3 = arith.constant 0 : index
    %c0_4 = arith.constant 0 : index
    %16 = vector.load %arg5[%c0_3, %c0_4] : memref<2x128xf32, #tpu.memory_space<vmem>>, vector<2x128xf32>
    %17 = arith.addf %16, %11 : vector<2x128xf32>
    %c0_5 = arith.constant 0 : index
    %c0_6 = arith.constant 0 : index
    %18 = vector.load %arg5[%c0_5, %c0_6] : memref<2x128xf32, #tpu.memory_space<vmem>>, vector<2x128xf32>
    tpu.vector_store %arg5[%c0_5, %c0_6], %17 {strides = array<i32>} : memref<2x128xf32, #tpu.memory_space<vmem>>, vector<2x128xf32>,
    %c0_7 = arith.constant 0 : index
    %c0_8 = arith.constant 0 : index
    %19 = vector.load %arg6[%c0_7, %c0_8] : memref<2x128xf32, #tpu.memory_space<vmem>>, vector<2x128xf32>
    %20 = arith.addf %19, %13 : vector<2x128xf32>
    %c0_9 = arith.constant 0 : index
    %c0_10 = arith.constant 0 : index
    %21 = vector.load %arg6[%c0_9, %c0_10] : memref<2x128xf32, #tpu.memory_space<vmem>>, vector<2x128xf32>
    tpu.vector_store %arg6[%c0_9, %c0_10], %20 {strides = array<i32>} : memref<2x128xf32, #tpu.memory_space<vmem>>, vector<2x128xf32>,
    %c0_11 = arith.constant 0 : index
    %c0_12 = arith.constant 0 : index
    %22 = vector.load %arg7[%c0_11, %c0_12] : memref<2x128xf32, #tpu.memory_space<vmem>>, vector<2x128xf32>
    %23 = arith.addf %22, %15 : vector<2x128xf32>
    %c0_13 = arith.constant 0 : index
    %c0_14 = arith.constant 0 : index
    %24 = vector.load %arg7[%c0_13, %c0_14] : memref<2x128xf32, #tpu.memory_space<vmem>>, vector<2x128xf32>
    tpu.vector_store %arg7[%c0_13, %c0_14], %23 {strides = array<i32>} : memref<2x128xf32, #tpu.memory_space<vmem>>, vector<2x128xf32>,
    %c0_i32_15 = arith.constant 0 : i32
    %25 = arith.cmpi eq, %arg1, %c0_i32_15 : i32
    %26 = arith.extui %25 : i1 to i32
    %c0_i32_16 = arith.constant 0 : i32
    %27 = arith.cmpi ne, %26, %c0_i32_16 : i32
    scf.if %27 {
      %c0_17 = arith.constant 0 : index
      %c0_18 = arith.constant 0 : index
      %28 = vector.load %arg5[%c0_17, %c0_18] : memref<2x128xf32, #tpu.memory_space<vmem>>, vector<2x128xf32>
      %cst_19 = arith.constant dense<0.000000e+00> : vector<2xf32>
      %29 = vector.multi_reduction <add>, %28, %cst_19 [1] : vector<2x128xf32> to vector<2xf32>
      %30 = vector.shape_cast %29 : vector<2xf32> to vector<2x1xf32>
      %c0_20 = arith.constant 0 : index
      %c0_21 = arith.constant 0 : index
      %31 = vector.load %arg6[%c0_20, %c0_21] : memref<2x128xf32, #tpu.memory_space<vmem>>, vector<2x128xf32>
      %cst_22 = arith.constant dense<0.000000e+00> : vector<2xf32>
      %32 = vector.multi_reduction <add>, %31, %cst_22 [1] : vector<2x128xf32> to vector<2xf32>
      %33 = vector.shape_cast %32 : vector<2xf32> to vector<2x1xf32>
      %c0_23 = arith.constant 0 : index
      %c0_24 = arith.constant 0 : index
      %34 = vector.load %arg7[%c0_23, %c0_24] : memref<2x128xf32, #tpu.memory_space<vmem>>, vector<2x128xf32>
      %cst_25 = arith.constant dense<0.000000e+00> : vector<2xf32>
      %35 = vector.multi_reduction <add>, %34, %cst_25 [1] : vector<2x128xf32> to vector<2xf32>
      %36 = vector.shape_cast %35 : vector<2xf32> to vector<2x1xf32>
      %37 = arith.addf %30, %33 : vector<2x1xf32>
      %cst_26 = arith.constant 2.000000e+00 : f32
      %38 = vector.broadcast %cst_26 : f32 to vector<2x1xf32>
      %39 = arith.mulf %38, %36 : vector<2x1xf32>
      %40 = arith.subf %37, %39 : vector<2x1xf32>
      %cst_27 = arith.constant 0.000000e+00 : f32
      %41 = vector.broadcast %cst_27 : f32 to vector<2x1xf32>
      %42 = arith.maximumf %40, %41 : vector<2x1xf32>
      %cst_28 = arith.constant 1.000000e-07 : f32
      %43 = vector.broadcast %cst_28 : f32 to vector<2x1xf32>
      %44 = arith.addf %42, %43 : vector<2x1xf32>
      %cst_29 = arith.constant 1.000000e-07 : f32
      %45 = vector.broadcast %cst_29 : f32 to vector<2x1xf32>
      %46 = arith.addf %30, %45 : vector<2x1xf32>
      %47 = math.log %46 : vector<2x1xf32>
      %cst_30 = arith.constant 0.434294492 : f32
      %48 = vector.broadcast %cst_30 : f32 to vector<2x1xf32>
      %49 = arith.mulf %47, %48 : vector<2x1xf32>
      %50 = math.log %44 : vector<2x1xf32>
      %cst_31 = arith.constant 0.434294492 : f32
      %51 = vector.broadcast %cst_31 : f32 to vector<2x1xf32>
      %52 = arith.mulf %50, %51 : vector<2x1xf32>
      %53 = arith.subf %49, %52 : vector<2x1xf32>
      %cst_32 = arith.constant 1.000000e+01 : f32
      %54 = vector.broadcast %cst_32 : f32 to vector<2x1xf32>
      %55 = arith.mulf %54, %53 : vector<2x1xf32>
      %c0_33 = arith.constant 0 : index
      %c0_34 = arith.constant 0 : index
      %56 = vector.load %arg4[%c0_33, %c0_34] : memref<2x1xf32, #tpu.memory_space<vmem>>, vector<2x1xf32>
      tpu.vector_store %arg4[%c0_33, %c0_34], %55 {strides = array<i32>} : memref<2x1xf32, #tpu.memory_space<vmem>>, vector<2x1xf32>,
    } else {
    }
    return
  }
  func.func @transform_0(%arg0: i32, %arg1: i32) -> (i32, i32) {
    %c0_i32 = arith.constant 0 : i32
    return %arg0, %arg1 : i32, i32
  }
  func.func @transform_1(%arg0: i32, %arg1: i32) -> (i32, i32) {
    %c0_i32 = arith.constant 0 : i32
    return %arg0, %arg1 : i32, i32
  }
  func.func @transform_2(%arg0: i32, %arg1: i32) -> (i32, i32) {
    %c0_i32 = arith.constant 0 : i32
    %c0_i32_0 = arith.constant 0 : i32
    return %arg0, %c0_i32 : i32, i32
  }
}

</mosaic_0001>

<bundles_post_ra>
// kernel: tpu_custom_call.1
= control target key start
LH: loop header
LB: loop body
LE: loop exit
PB: predicated region body
PF: predicated region fallthrough
CT: control target
= control target key end

     0   :  { %7 = vsyncpa [#allocation6], 0  ;;  %s175_s0 = inlined_call_operand.hbm [shape: f32[2,128], index: 0, kind: input, shape index: {}]   ;;  %s176_s1 = inlined_call_operand.hbm [shape: f32[2,128], index: 1, kind: input, shape index: {}]   ;;  %s177_s2 = inlined_call_operand.vmem [shape: f32[2,1], index: 2, kind: output, shape index: {}]  }
   0x1   :  { %8 = vsyncpa [#allocation8], 0  ;;  %s148_s9 = smov [#allocation5]   ;;  %s149_s11 = smov [#allocation7]  }
   0x2   :  { %s15_s10 = sshll.u32 %s148_s9, 4  ;;  %s25_s12 = sshll.u32 %s149_s11, 4  ;;  %s16_s10 = int_to_ptr.vmem [resolvable:$true] %s15_s10  ;;  %s26_s12 = int_to_ptr.vmem [resolvable:$true] %s25_s12 }
   0x3   :  { %s112_s13 = scalar_lea.vmem %s16_s10, 32  ;;  %p117_p1 = scmp.lt.s32.totalorder %s16_s10, %s16_s10 }
   0x4   :  { %p113_p0 = scmp.ne.s32.totalorder %s16_s10, %s112_s13  ;;  %p118_p2 = scmp.lt.s32.totalorder %s112_s13, %s112_s13 }
   0x6   :  { %p119_p3 = por %p118_p2, %p117_p1 }
   0x8   :  { %p120_p4 = pnand %p119_p3, %p113_p0 }
   0xa   :  { %123 = shalt.err (!%p120_p4)
}
   0xb   :  { %18 = dma.hbm_to_vmem [thread:$0]  %s175_s0, 32, %s16_s10, [#allocation6]  }
   0xc   :  { %s132_s16 = scalar_lea.vmem %s26_s12, 32  ;;  %p137_p6 = scmp.lt.s32.totalorder %s26_s12, %s26_s12 }
   0xd   :  { %p133_p5 = scmp.ne.s32.totalorder %s26_s12, %s132_s16  ;;  %p138_p7 = scmp.lt.s32.totalorder %s132_s16, %s132_s16 }
   0xf   :  { %p139_p8 = por %p138_p7, %p137_p6 }
  0x11   :  { %p140_p9 = pnand %p139_p8, %p133_p5 }
  0x13   :  { %143 = shalt.err (!%p140_p9)
}
  0x14   :  { %28 = dma.hbm_to_vmem [thread:$0]  %s176_s1, 32, %s26_s12, [#allocation8]  }
  0x15   :  { %144 = dma.done.wait [#allocation6], 32  }
  0x16   :  { %145 = vsyncadd [#allocation6], 4294967264 }
  0x17   :  { %146 = dma.done.wait [#allocation8], 32  }
  0x18   :  { %147 = vsyncadd [#allocation8], 4294967264  ;;  %v150_v0 = vmov 0.0   ;;  %v42_v1 = vld [vmem:[#allocation7] sm:$0x3]  ;;  %vm63_vm0 = vcmask 1041408  }
  0x19   :  { %39 = vst [vmem:[#allocation2] sm:$0x3] %v150_v0  ;;  %40 = vst [vmem:[#allocation3] sm:$0x3] %v150_v0  ;;  %v43_v2 = vld [vmem:[#allocation5] sm:$0x3]  ;;  %v44_v3 = vmul.f32 %v42_v1, %v42_v1 }
  0x1a   :  { %41 = vst [vmem:[#allocation4] sm:$0x3] %v150_v0  ;;  %v48_v5 = vmul.f32 %v43_v2, %v42_v1  ;;  %v46_v7 = vmul.f32 %v43_v2, %v43_v2  ;;  %vm89_vm1 = vcmask 1024  }
  0x20   :  { %v50_v4 = vld [vmem:[#allocation2] sm:$0x3]  ;;  %v53_v8 = vld [vmem:[#allocation3] sm:$0x3] }
  0x21   :  { %v56_v6 = vld [vmem:[#allocation4] sm:$0x3]  ;;  %v51_v9 = vadd.f32 %v50_v4, %v44_v3  ;;  %v54_v11 = vadd.f32 %v53_v8, %v46_v7 }
  0x22   :  { %v57_v10 = vadd.f32 %v56_v6, %v48_v5 }
  0x23   :  { %52 = vst [vmem:[#allocation2] sm:$0x3] %v51_v9  ;;  %55 = vst [vmem:[#allocation3] sm:$0x3] %v54_v11 }
  0x24   :  { %58 = vst [vmem:[#allocation4] sm:$0x3] %v57_v10 }
  0x2a   :  { %v62_v12 = vld [vmem:[#allocation2] sm:$0x3]  ;;  %v67_v14 = vld [vmem:[#allocation3] sm:$0x3] }
  0x2b   :  { %v71_v13 = vld [vmem:[#allocation4] sm:$0x3]  ;;  %v64_v15 = vsel %vm63_vm0, %v62_v12, 0.0  ;;  %v68_v17 = vsel %vm63_vm0, %v67_v14, 0.0 }
  0x2c   :  { %v72_v16 = vsel %vm63_vm0, %v71_v13, 0.0  ;;  %65 = vadd.xlane.f32.xlu0 %v64_v15 }
  0x2d   :  { %73 = vadd.xlane.f32.xlu1 %v72_v16 }
  0x30   :  { %69 = vadd.xlane.f32.xlu0 %v68_v17 }
  0xb5   :  { %v66_v18 = vpop.xlane.xlu0 %65 }
  0xb6   :  { %v74_v19 = vpop.xlane.xlu1 %73  ;;  %v80_v22 = vadd.f32 1e-07, %v66_v18 }
  0xb7   :  { %v76_v20 = vmul.f32 2.0, %v74_v19 }
  0xb8   :  { %100 = vlog2.f32 %v80_v22 }
  0xb9   :  { %v70_v21 = vpop.xlane.xlu0 %69 }
  0xba   :  { %v75_v23 = vadd.f32 %v70_v21, %v66_v18 }
  0xbc   :  { %v77_v24 = vsub.f32 %v75_v23, %v76_v20 }
  0xbe   :  { %v78_v25 = vmax.f32 %v77_v24, 0.0 }
  0xc0   :  { %v79_v26 = vadd.f32 1e-07, %v78_v25 }
  0xc2   :  { %102 = vlog2.f32 %v79_v26 }
  0xc5   :  { %v101_v27 = vpop.eup %100 }
  0xc6   :  { %v82_v28 = vmul.f32 0.6931472, %v101_v27 }
  0xc8   :  { %v83_v31 = vmul.f32 0.4342945, %v82_v28 }
  0xcf   :  { %v103_v29 = vpop.eup %102 }
  0xd0   :  { %v85_v30 = vmul.f32 0.6931472, %v103_v29 }
  0xd2   :  { %v86_v32 = vmul.f32 0.4342945, %v85_v30 }
  0xd4   :  { %v87_v33 = vsub.f32 %v83_v31, %v86_v32 }
  0xd6   :  { %v88_v34 = vmul.f32 10.0, %v87_v33 }
  0xd8   :  { %90 = vst.msk [vmem:[%s177_s2] sm:$0x3] %vm89_vm1, %v88_v34 }
  0xd9   :  { %95 = vsyncpa [#allocation6], 1 }
  0xda   :  { %96 = vsyncpa [#allocation8], 1 }

</bundles_post_ra>
